<compile_context>
chip_gen: v6e
topology: v6e:2x2x1
jax: 0.10.0
libtpu: 0.0.40
codegen_flags: <defaults>
</compile_context>

<pallas_src>
import functools

import jax
import jax.numpy as jnp
from jax import lax
from jax.experimental import pallas as pl
from jax.experimental.pallas import tpu as pltpu


def _policy_kernel(x_ref, w1_ref, b1_ref, w2_ref, b2_ref, w3_ref, b3_ref,
                   out_ref, *, max_action):
    # Whole MLP hot path on one lane-dense batch tile, entirely in VMEM/vregs.
    x = x_ref[...]                                                   # [Bt, S] f32

    # h1 = W1 @ x^T  (contract S with S)  -> [H, Bt]; MXU, f32 accumulation.
    h1 = lax.dot_general(w1_ref[...], x, (((1,), (1,)), ((), ())),
                         preferred_element_type=jnp.float32)
    h1 = jnp.maximum(h1 + b1_ref[...], 0.0)                          # [H, Bt]

    h2 = jnp.dot(w2_ref[...], h1, preferred_element_type=jnp.float32)
    h2 = jnp.maximum(h2 + b2_ref[...], 0.0)                          # [H, Bt]

    h3 = jnp.dot(w3_ref[...], h2, preferred_element_type=jnp.float32)
    h3 = h3 + b3_ref[...]                                            # [A, Bt]

    # tanh runs on the EUP (its own bundle slot); single scale in the epilogue.
    out_ref[...] = (max_action * jnp.tanh(h3)).astype(out_ref.dtype)


def policy_forward(state, params, max_action, *, batch_tile=512):
    """state: [B, state_dim] float32. Returns [B, action_dim] float32.

    params: (w1, b1, w2, b2, w3, b3) with PyTorch-native shapes
            w: [out, in], b: [out, 1].
    """
    w1, b1, w2, b2, w3, b3 = params
    B, S = state.shape
    H = w1.shape[0]
    A = w3.shape[0]

    # Lane-aligned batch tile: multiple of 128, shrunk for small batches so we
    # do not pad tiny inputs up to a huge tile.
    bt = min(batch_tile, pl.cdiv(B, 128) * 128)
    bt = max(128, (bt // 128) * 128)
    Bp = pl.cdiv(B, bt) * bt

    # Only pad rows when bt does not divide B (zero rows are dropped at the end).
    x = state
    if Bp != B:
        x = jnp.pad(x, ((0, Bp - B), (0, 0)))

    grid = (Bp // bt,)

    kernel = functools.partial(_policy_kernel, max_action=float(max_action))

    out_t = pl.pallas_call(
        kernel,
        out_shape=jax.ShapeDtypeStruct((A, Bp), jnp.float32),
        grid=grid,
        in_specs=[
            pl.BlockSpec((bt, S), lambda i: (i, 0)),   # state tile [Bt, S]
            pl.BlockSpec((H, S), lambda i: (0, 0)),    # W1 (VMEM-resident)
            pl.BlockSpec((H, 1), lambda i: (0, 0)),    # b1
            pl.BlockSpec((H, H), lambda i: (0, 0)),    # W2
            pl.BlockSpec((H, 1), lambda i: (0, 0)),    # b2
            pl.BlockSpec((A, H), lambda i: (0, 0)),    # W3
            pl.BlockSpec((A, 1), lambda i: (0, 0)),    # b3
        ],
        out_specs=pl.BlockSpec((A, bt), lambda i: (0, i)),
        compiler_params=pltpu.CompilerParams(
            dimension_semantics=("parallel",)),        # shard batch tiles across TCs
    )(x, w1, b1, w2, b2, w3, b3)

    # Back to [B, action_dim]; padded lane columns are dropped here (tiny: A rows).
    return out_t[:, :B].T


def init_params(key, state_dim, action_dim, hidden=32):
    """Deterministic synthetic parameters (Kaiming-uniform-like), stored
    PyTorch-native: W as [out, in], b as [out, 1]."""
    ks = jax.random.split(key, 6)

    def lin(kw, kb, fan_in, fan_out):
        bound = 1.0 / jnp.sqrt(fan_in)
        w = jax.random.uniform(kw, (fan_out, fan_in), jnp.float32, -bound, bound)
        b = jax.random.uniform(kb, (fan_out, 1), jnp.float32, -bound, bound)
        return w, b

    w1, b1 = lin(ks[0], ks[1], state_dim, hidden)
    w2, b2 = lin(ks[2], ks[3], hidden, hidden)
    w3, b3 = lin(ks[4], ks[5], hidden, action_dim)
    return (w1, b1, w2, b2, w3, b3)


if __name__ == "__main__":
    key = jax.random.PRNGKey(0)
    k_state, k_params = jax.random.split(key)

    batch = 2
    state_dim = 8
    action_dim = 4
    max_action = 2.0

    state = jax.random.normal(k_state, (batch, state_dim), jnp.float32)
    params = init_params(k_params, state_dim, action_dim)

    fwd = jax.jit(lambda s, p: policy_forward(s, p, max_action))
    out = jax.block_until_ready(fwd(state, params))

    # Reference check in plain JAX (same math as the PyTorch module,
    # with the PyTorch [out, in] weight convention).
    w1, b1, w2, b2, w3, b3 = params
    h = jnp.maximum(state @ w1.T + b1.T, 0.0)
    h = jnp.maximum(h @ w2.T + b2.T, 0.0)
    ref = max_action * jnp.tanh(h @ w3.T + b3.T)

    assert out.shape == (batch, action_dim)
    assert jnp.allclose(out, ref, atol=1e-5), "mismatch vs reference"

    print("KERNEL_OK")
</pallas_src>

<mosaic_0001>
module attributes {stable_mosaic.version = 11 : i64} {
  func.func @_policy_kernel(%arg0: i32, %arg1: memref<128x8xf32, #tpu.memory_space<vmem>>, %arg2: memref<32x8xf32, #tpu.memory_space<vmem>>, %arg3: memref<32x1xf32, #tpu.memory_space<vmem>>, %arg4: memref<32x32xf32, #tpu.memory_space<vmem>>, %arg5: memref<32x1xf32, #tpu.memory_space<vmem>>, %arg6: memref<4x32xf32, #tpu.memory_space<vmem>>, %arg7: memref<4x1xf32, #tpu.memory_space<vmem>>, %arg8: memref<4x128xf32, #tpu.memory_space<vmem>>) attributes {dimension_semantics = [#tpu.dimension_semantics<parallel>], iteration_bounds = array<i64: 1>, scalar_prefetch = 0 : i64, scratch_operands = 0 : i64, tpu.core_type = #tpu.core_type<tc>, window_params = [{transform_indices = @transform_0, window_bounds = array<i64: 128, 8>}, {pipeline_mode = #tpu.pipeline_mode<synchronous>, transform_indices = @transform_1, window_bounds = array<i64: 32, 8>}, {pipeline_mode = #tpu.pipeline_mode<synchronous>, transform_indices = @transform_2, window_bounds = array<i64: 32, 1>}, {pipeline_mode = #tpu.pipeline_mode<synchronous>, transform_indices = @transform_3, window_bounds = array<i64: 32, 32>}, {pipeline_mode = #tpu.pipeline_mode<synchronous>, transform_indices = @transform_4, window_bounds = array<i64: 32, 1>}, {pipeline_mode = #tpu.pipeline_mode<synchronous>, transform_indices = @transform_5, window_bounds = array<i64: 4, 32>}, {pipeline_mode = #tpu.pipeline_mode<synchronous>, transform_indices = @transform_6, window_bounds = array<i64: 4, 1>}, {transform_indices = @transform_7, window_bounds = array<i64: 4, 128>}]} {
    %c0 = arith.constant 0 : index
    %c0_0 = arith.constant 0 : index
    %0 = vector.load %arg1[%c0, %c0_0] : memref<128x8xf32, #tpu.memory_space<vmem>>, vector<128x8xf32>
    %c0_1 = arith.constant 0 : index
    %c0_2 = arith.constant 0 : index
    %1 = vector.load %arg2[%c0_1, %c0_2] : memref<32x8xf32, #tpu.memory_space<vmem>>, vector<32x8xf32>
    %cst = arith.constant dense<0.000000e+00> : vector<32x128xf32>
    %2 = tpu.matmul %1, %0, %cst {dimension_numbers = #tpu.dot_dimension_numbers<[1], [1], [0], [0], [0, 0, 1, 0], [], []>} : vector<32x8xf32>, vector<128x8xf32>, vector<32x128xf32> -> vector<32x128xf32>
    %c0_3 = arith.constant 0 : index
    %c0_4 = arith.constant 0 : index
    %3 = vector.load %arg3[%c0_3, %c0_4] : memref<32x1xf32, #tpu.memory_space<vmem>>, vector<32x1xf32>
    %4 = vector.broadcast %3 : vector<32x1xf32> to vector<32x128xf32>
    %5 = arith.addf %2, %4 : vector<32x128xf32>
    %cst_5 = arith.constant 0.000000e+00 : f32
    %6 = vector.broadcast %cst_5 : f32 to vector<32x128xf32>
    %7 = arith.maximumf %5, %6 : vector<32x128xf32>
    %c0_6 = arith.constant 0 : index
    %c0_7 = arith.constant 0 : index
    %8 = vector.load %arg4[%c0_6, %c0_7] : memref<32x32xf32, #tpu.memory_space<vmem>>, vector<32x32xf32>
    %cst_8 = arith.constant dense<0.000000e+00> : vector<32x128xf32>
    %9 = tpu.matmul %8, %7, %cst_8 {dimension_numbers = #tpu.dot_dimension_numbers<[1], [0], [0], [1], [0, 0, 1, 1], [], []>} : vector<32x32xf32>, vector<32x128xf32>, vector<32x128xf32> -> vector<32x128xf32>
    %c0_9 = arith.constant 0 : index
    %c0_10 = arith.constant 0 : index
    %10 = vector.load %arg5[%c0_9, %c0_10] : memref<32x1xf32, #tpu.memory_space<vmem>>, vector<32x1xf32>
    %11 = vector.broadcast %10 : vector<32x1xf32> to vector<32x128xf32>
    %12 = arith.addf %9, %11 : vector<32x128xf32>
    %cst_11 = arith.constant 0.000000e+00 : f32
    %13 = vector.broadcast %cst_11 : f32 to vector<32x128xf32>
    %14 = arith.maximumf %12, %13 : vector<32x128xf32>
    %c0_12 = arith.constant 0 : index
    %c0_13 = arith.constant 0 : index
    %15 = vector.load %arg6[%c0_12, %c0_13] : memref<4x32xf32, #tpu.memory_space<vmem>>, vector<4x32xf32>
    %cst_14 = arith.constant dense<0.000000e+00> : vector<4x128xf32>
    %16 = tpu.matmul %15, %14, %cst_14 {dimension_numbers = #tpu.dot_dimension_numbers<[1], [0], [0], [1], [0, 0, 1, 1], [], []>} : vector<4x32xf32>, vector<32x128xf32>, vector<4x128xf32> -> vector<4x128xf32>
    %c0_15 = arith.constant 0 : index
    %c0_16 = arith.constant 0 : index
    %17 = vector.load %arg7[%c0_15, %c0_16] : memref<4x1xf32, #tpu.memory_space<vmem>>, vector<4x1xf32>
    %18 = vector.broadcast %17 : vector<4x1xf32> to vector<4x128xf32>
    %19 = arith.addf %16, %18 : vector<4x128xf32>
    %20 = math.tanh %19 : vector<4x128xf32>
    %cst_17 = arith.constant 2.000000e+00 : f32
    %21 = vector.broadcast %cst_17 : f32 to vector<4x128xf32>
    %22 = arith.mulf %21, %20 : vector<4x128xf32>
    %c0_18 = arith.constant 0 : index
    %c0_19 = arith.constant 0 : index
    %23 = vector.load %arg8[%c0_18, %c0_19] : memref<4x128xf32, #tpu.memory_space<vmem>>, vector<4x128xf32>
    tpu.vector_store %arg8[%c0_18, %c0_19], %22 {strides = array<i32>} : memref<4x128xf32, #tpu.memory_space<vmem>>, vector<4x128xf32>,
    return
  }
  func.func @transform_0(%arg0: i32) -> (i32, i32) {
    %c0_i32 = arith.constant 0 : i32
    %c0_i32_0 = arith.constant 0 : i32
    return %arg0, %c0_i32 : i32, i32
  }
  func.func @transform_1(%arg0: i32) -> (i32, i32) {
    %c0_i32 = arith.constant 0 : i32
    %c0_i32_0 = arith.constant 0 : i32
    %c0_i32_1 = arith.constant 0 : i32
    return %c0_i32, %c0_i32_0 : i32, i32
  }
  func.func @transform_2(%arg0: i32) -> (i32, i32) {
    %c0_i32 = arith.constant 0 : i32
    %c0_i32_0 = arith.constant 0 : i32
    %c0_i32_1 = arith.constant 0 : i32
    return %c0_i32, %c0_i32_0 : i32, i32
  }
  func.func @transform_3(%arg0: i32) -> (i32, i32) {
    %c0_i32 = arith.constant 0 : i32
    %c0_i32_0 = arith.constant 0 : i32
    %c0_i32_1 = arith.constant 0 : i32
    return %c0_i32, %c0_i32_0 : i32, i32
  }
  func.func @transform_4(%arg0: i32) -> (i32, i32) {
    %c0_i32 = arith.constant 0 : i32
    %c0_i32_0 = arith.constant 0 : i32
    %c0_i32_1 = arith.constant 0 : i32
    return %c0_i32, %c0_i32_0 : i32, i32
  }
  func.func @transform_5(%arg0: i32) -> (i32, i32) {
    %c0_i32 = arith.constant 0 : i32
    %c0_i32_0 = arith.constant 0 : i32
    %c0_i32_1 = arith.constant 0 : i32
    return %c0_i32, %c0_i32_0 : i32, i32
  }
  func.func @transform_6(%arg0: i32) -> (i32, i32) {
    %c0_i32 = arith.constant 0 : i32
    %c0_i32_0 = arith.constant 0 : i32
    %c0_i32_1 = arith.constant 0 : i32
    return %c0_i32, %c0_i32_0 : i32, i32
  }
  func.func @transform_7(%arg0: i32) -> (i32, i32) {
    %c0_i32 = arith.constant 0 : i32
    %c0_i32_0 = arith.constant 0 : i32
    return %c0_i32, %arg0 : i32, i32
  }
}

</mosaic_0001>

<bundles_post_ra>
// kernel: _lambda_.1
= control target key start
LH: loop header
LB: loop body
LE: loop exit
PB: predicated region body
PF: predicated region fallthrough
CT: control target
= control target key end

     0   :  { %vm70_vm0 = vcmask 64512   ;;  %v565_v2 = vmov 0   ;;  %vm248_vm1 = vcmask 261120   ;;  %v566_v50 = vmov 0.0   ;;  %s754_s0 = inlined_call_operand.vmem [shape: f32[128,8], index: 0, kind: input, shape index: {}]   ;;  %s755_s1 = inlined_call_operand.vmem [shape: f32[32,8], index: 1, kind: input, shape index: {}]   ;;  %s756_s2 = inlined_call_operand.vmem [shape: f32[32,1], index: 2, kind: input, shape index: {}]   ;;  %s757_s4 = inlined_call_operand.vmem [shape: f32[32,1], index: 4, kind: input, shape index: {}]   ;;  %s758_s6 = inlined_call_operand.vmem [shape: f32[4,1], index: 6, kind: input, shape index: {}]   ;;  %s759_s3 = inlined_call_operand.vmem [shape: f32[32,32], index: 3, kind: input, shape index: {}]   ;;  %s760_s5 = inlined_call_operand.vmem [shape: f32[4,32], index: 5, kind: input, shape index: {}]   ;;  %s761_s7 = inlined_call_operand.vmem [shape: f32[4,128], index: 7, kind: output, shape index: {}]  }
   0x1   :  { %v41_v0 = vld [vmem:[%s754_s0 + $0x78] sm:$0xff]  ;;  %v40_v1 = vld [vmem:[%s754_s0 + $0x70] sm:$0xff]  ;;  %561 = vset.pattern.permute.xlu0 %v565_v2  ;;  %562 = vset.pattern.permute.xlu1 %v565_v2  ;;  %v39_v3 = vld [vmem:[%s754_s0 + $0x68] sm:$0xff]  ;;  %vm567_vm2 = vmmov 0  }
   0x2   :  { %495 = vmatprep.subr.msk.mxu0 %vm70_vm0, %v41_v0  ;;  %v42_v4 = vld [vmem:[%s755_s1] sm:$0xff]  ;;  %v49_v5 = vld [vmem:[%s756_s2 + $0x18] sm:$0xff]  ;;  %v47_v6 = vld [vmem:[%s756_s2 + $0x8] sm:$0xff] }
   0x3   :  { %496 = vmatpush3.xpose.msk.msra.mxu0 %vm70_vm0, %v41_v0  ;;  %527 = vmatprep.mubr.msk.f32.mxu0 %vm70_vm0, %v42_v4  ;;  %v38_v7 = vld [vmem:[%s754_s0 + $0x60] sm:$0xff]  ;;  %v48_v8 = vld [vmem:[%s756_s2 + $0x10] sm:$0xff]  ;;  %v37_v10 = vld [vmem:[%s754_s0 + $0x58] sm:$0xff] }
   0x4   :  { %497 = vmatprep.subr.msk.mxu0 %vm70_vm0, %v40_v1  ;;  %67 = vperm.xlu0 %561, %v49_v5   ;;  %v46_v9 = vld [vmem:[%s756_s2] sm:$0xff]  ;;  %v227_v11 = vld [vmem:[%s757_s4 + $0x18] sm:$0xff]  ;;  %v226_v12 = vld [vmem:[%s757_s4 + $0x10] sm:$0xff] }
   0x5   :  { %57 = vperm.xlu1 %562, %v47_v6   ;;  %v36_v13 = vld [vmem:[%s754_s0 + $0x50] sm:$0xff]  ;;  %v225_v14 = vld [vmem:[%s757_s4 + $0x8] sm:$0xff]  ;;  %v224_v15 = vld [vmem:[%s757_s4] sm:$0xff] }
   0x6   :  { %v35_v16 = vld [vmem:[%s754_s0 + $0x48] sm:$0xff]  ;;  %v351_v17 = vld [vmem:[%s758_s6] sm:$0xf]  ;;  %v33_v19 = vld [vmem:[%s754_s0 + $0x38] sm:$0xff] }
   0x7   :  { %498 = vmatpush3.xpose.msk.msra.mxu0 %vm70_vm0, %v40_v1  ;;  %v34_v18 = vld [vmem:[%s754_s0 + $0x40] sm:$0xff]  ;;  %v32_v20 = vld [vmem:[%s754_s0 + $0x30] sm:$0xff]  ;;  %v31_v21 = vld [vmem:[%s754_s0 + $0x28] sm:$0xff] }
   0x8   :  { %499 = vmatprep.subr.msk.mxu0 %vm70_vm0, %v39_v3  ;;  %62 = vperm.xlu0 %561, %v48_v8   ;;  %v30_v22 = vld [vmem:[%s754_s0 + $0x20] sm:$0xff]  ;;  %v29_v23 = vld [vmem:[%s754_s0 + $0x18] sm:$0xff]  ;;  %v28_v24 = vld [vmem:[%s754_s0 + $0x10] sm:$0xff] }
   0x9   :  { %52 = vperm.xlu1 %562, %v46_v9   ;;  %v27_v25 = vld [vmem:[%s754_s0 + $0x8] sm:$0xff]  ;;  %v26_v26 = vld [vmem:[%s754_s0] sm:$0xff]  ;;  %v44_v28 = vld [vmem:[%s755_s1 + $0x10] sm:$0xff] }
   0xa   :  { %v43_v27 = vld [vmem:[%s755_s1 + $0x8] sm:$0xff]  ;;  %v45_v29 = vld [vmem:[%s755_s1 + $0x18] sm:$0xff]  ;;  %v220_v30 = vld [vmem:[%s759_s3] sm:$0xff] }
   0xb   :  { %500 = vmatpush3.xpose.msk.msra.mxu0 %vm70_vm0, %v39_v3  ;;  %541 = vmatprep.mubr.msk.f32.mxu1 %vm248_vm1, %v220_v30  ;;  %v221_v47 = vld [vmem:[%s759_s3 + $0x8] sm:$0xff]  ;;  %v222_v48 = vld [vmem:[%s759_s3 + $0x10] sm:$0xff]  ;;  %v223_v49 = vld [vmem:[%s759_s3 + $0x18] sm:$0xff] }
   0xc   :  { %501 = vmatprep.subr.msk.mxu0 %vm70_vm0, %v38_v7  ;;  %245 = vperm.xlu0 %561, %v227_v11   ;;  %v350_v3 = vld [vmem:[%s760_s5] sm:$0xf] }
   0xd   :  { %240 = vperm.xlu1 %562, %v226_v12  }
   0xf   :  { %502 = vmatpush3.xpose.msk.msra.mxu0 %vm70_vm0, %v38_v7 }
  0x10   :  { %503 = vmatprep.subr.msk.mxu0 %vm70_vm0, %v37_v10  ;;  %235 = vperm.xlu0 %561, %v225_v14  }
  0x11   :  { %230 = vperm.xlu1 %562, %v224_v15  }
  0x13   :  { %504 = vmatpush3.xpose.msk.msra.mxu0 %vm70_vm0, %v37_v10 }
  0x14   :  { %505 = vmatprep.subr.msk.mxu0 %vm70_vm0, %v36_v13  ;;  %354 = vperm.xlu0 %561, %v351_v17  }
  0x17   :  { %506 = vmatpush3.xpose.msk.msra.mxu0 %vm70_vm0, %v36_v13 }
  0x18   :  { %507 = vmatprep.subr.msk.mxu0 %vm70_vm0, %v35_v16 }
  0x1b   :  { %508 = vmatpush3.xpose.msk.msra.mxu0 %vm70_vm0, %v35_v16 }
  0x1c   :  { %509 = vmatprep.subr.msk.mxu0 %vm70_vm0, %v34_v18 }
  0x1f   :  { %510 = vmatpush3.xpose.msk.msra.mxu0 %vm70_vm0, %v34_v18 }
  0x20   :  { %511 = vmatprep.subr.msk.mxu0 %vm70_vm0, %v33_v19 }
  0x23   :  { %512 = vmatpush3.xpose.msk.msra.mxu0 %vm70_vm0, %v33_v19 }
  0x24   :  { %513 = vmatprep.subr.msk.mxu0 %vm70_vm0, %v32_v20 }
  0x27   :  { %514 = vmatpush3.xpose.msk.msra.mxu0 %vm70_vm0, %v32_v20 }
  0x28   :  { %515 = vmatprep.subr.msk.mxu0 %vm70_vm0, %v31_v21 }
  0x2b   :  { %516 = vmatpush3.xpose.msk.msra.mxu0 %vm70_vm0, %v31_v21 }
  0x2c   :  { %517 = vmatprep.subr.msk.mxu0 %vm70_vm0, %v30_v22 }
  0x2f   :  { %518 = vmatpush3.xpose.msk.msra.mxu0 %vm70_vm0, %v30_v22 }
  0x30   :  { %519 = vmatprep.subr.msk.mxu0 %vm70_vm0, %v29_v23 }
  0x33   :  { %520 = vmatpush3.xpose.msk.msra.mxu0 %vm70_vm0, %v29_v23 }
  0x34   :  { %521 = vmatprep.subr.msk.mxu0 %vm70_vm0, %v28_v24 }
  0x37   :  { %522 = vmatpush3.xpose.msk.msra.mxu0 %vm70_vm0, %v28_v24 }
  0x38   :  { %523 = vmatprep.subr.msk.mxu0 %vm70_vm0, %v27_v25 }
  0x3b   :  { %524 = vmatpush3.xpose.msk.msra.mxu0 %vm70_vm0, %v27_v25 }
  0x3c   :  { %525 = vmatprep.subr.msk.mxu0 %vm70_vm0, %v26_v26 }
  0x3f   :  { %526 = vmatpush3.xpose.msk.msra.mxu0 %vm70_vm0, %v26_v26 }
  0x42   :  { %528 = vmatmul.mubr.msk.f32.vlgmr.msra.gmra.mxu0 %vm70_vm0, %v43_v27 }
  0x43   :  { %530 = vmatprep.mubr.msk.f32.mxu0 %vm70_vm0, %v44_v28 }
  0x46   :  { %531 = vmatmul.mubr.msk.f32.gmra.mxu0 %vm70_vm0, %v45_v29 }
  0x7f   :  { %v68_v31 = vpop.permute.xlu0 %67 }
  0x80   :  { %v58_v33 = vpop.permute.xlu1 %57 }
  0x83   :  { %v63_v37 = vpop.permute.xlu0 %62 }
  0x84   :  { %v53_v42 = vpop.permute.xlu1 %52 }
  0x87   :  { %v246_v51 = vpop.permute.xlu0 %245 }
  0x88   :  { %v241_v53 = vpop.permute.xlu1 %240 }
  0x8b   :  { %v236_v57 = vpop.permute.xlu0 %235 }
  0x8c   :  { %v231_v62 = vpop.permute.xlu1 %230 }
  0x8f   :  { %v355_v4 = vpop.permute.xlu0 %354 }
 0x102   :  { %v529_v32 = vpop.f32.mrf.mxu0 }
 0x103   :  { %v203_v39 = vadd.f32 %v529_v32, %v58_v33 }
 0x104   :  { %v197_v34 = vpop.f32.mrf.mxu0 }
 0x105   :  { %v198_v43 = vadd.f32 %v197_v34, %v53_v42  ;;  %v217_v45 = vmax.f32 %v203_v39, 0.0 }
 0x106   :  { %v532_v35 = vpop.f32.mrf.mxu0 }
 0x107   :  { %v213_v36 = vadd.f32 %v532_v35, %v68_v31  ;;  %v216_v46 = vmax.f32 %v198_v43, 0.0 }
 0x108   :  { %v207_v38 = vpop.f32.mrf.mxu0 }
 0x109   :  { %v219_v40 = vmax.f32 %v213_v36, 0.0  ;;  %v208_v41 = vadd.f32 %v207_v38, %v63_v37 }
 0x10b   :  { %v218_v44 = vmax.f32 %v208_v41, 0.0  ;;  %533 = vmatprep.subr.mxu1 %v219_v40 }
 0x10c   :  { %534 = vmatpush3.msra.mxu1 %v219_v40 }
 0x10d   :  { %535 = vmatprep.subr.mxu1 %v218_v44 }
 0x10e   :  { %536 = vmatpush3.msra.mxu1 %v218_v44 }
 0x10f   :  { %537 = vmatprep.subr.mxu1 %v217_v45 }
 0x110   :  { %538 = vmatpush3.msra.mxu1 %v217_v45 }
 0x111   :  { %539 = vmatprep.subr.mxu1 %v216_v46 }
 0x112   :  { %540 = vmatpush3.msra.mxu1 %v216_v46 }
 0x113   :  { %542 = vmatmul.mubr.msk.f32.vlgmr.msra.gmra.mxu1 %vm248_vm1, %v221_v47  ;;  %547 = vmatprep.subr.mxu1 %v566_v50 }
 0x114   :  { %544 = vmatprep.mubr.msk.f32.mxu1 %vm248_vm1, %v222_v48 }
 0x117   :  { %545 = vmatmul.mubr.msk.f32.gmra.mxu1 %vm248_vm1, %v223_v49 }
 0x118   :  { %555 = vmatprep.mubr.msk.f32.mxu1 %vm567_vm2, %v566_v50 }
 0x1d3   :  { %v543_v52 = vpop.f32.mrf.mxu1 }
 0x1d4   :  { %v333_v59 = vadd.f32 %v543_v52, %v236_v57 }
 0x1d5   :  { %v327_v54 = vpop.f32.mrf.mxu1 }
 0x1d6   :  { %v328_v63 = vadd.f32 %v327_v54, %v231_v62  ;;  %v347_v1 = vmax.f32 %v333_v59, 0.0 }
 0x1d7   :  { %v546_v55 = vpop.f32.mrf.mxu1 }
 0x1d8   :  { %v343_v56 = vadd.f32 %v546_v55, %v246_v51  ;;  %v346_v2 = vmax.f32 %v328_v63, 0.0 }
 0x1d9   :  { %v337_v58 = vpop.f32.mrf.mxu1 }
 0x1da   :  { %v349_v60 = vmax.f32 %v343_v56, 0.0  ;;  %v338_v61 = vadd.f32 %v337_v58, %v241_v53 }
 0x1dc   :  { %v348_v0 = vmax.f32 %v338_v61, 0.0  ;;  %548 = vmatpush3.msra.mxu1 %v349_v60 }
 0x1dd   :  { %549 = vmatprep.subr.mxu1 %v566_v50 }
 0x1de   :  { %550 = vmatpush3.msra.mxu1 %v348_v0 }
 0x1df   :  { %551 = vmatprep.subr.mxu1 %v566_v50 }
 0x1e0   :  { %552 = vmatpush3.msra.mxu1 %v347_v1 }
 0x1e1   :  { %553 = vmatprep.subr.mxu1 %v566_v50 }
 0x1e2   :  { %554 = vmatpush3.msra.mxu1 %v346_v2 }
 0x1e3   :  { %556 = vmatmul.mubr.msk.f32.vlgmr.msra.gmra.mxu1 %vm248_vm1, %v350_v3 }
 0x2a3   :  { %v426_v5 = vpop.f32.mrf.mxu1 }
 0x2a4   :  { %v427_v6 = vadd.f32 %v426_v5, %v355_v4 }
 0x2a5   :  { %v557_v7 = vpop.f32.mrf.mxu1 }
 0x2a6   :  { %563 = vtanh.f32 %v427_v6 }
 0x2b3   :  { %v564_v8 = vpop.eup %563 }
 0x2b4   :  { %v431_v9 = vmul.f32 2.0, %v564_v8 }
 0x2b6   :  { %432 = vst [vmem:[%s761_s7] sm:$0xf] %v431_v9 }

</bundles_post_ra>
